<compile_context>
chip_gen: v7x
topology: tpu7x:2x2x1
jax: 0.10.0
libtpu: 0.0.40
codegen_flags: <defaults>
</compile_context>

<pallas_src>
import functools

import jax
import jax.numpy as jnp
from jax import lax
from jax.experimental import pallas as pl
from jax.experimental.pallas import tpu as pltpu


# ----------------------------------------------------------------------------
# in-kernel helpers (channels-in-sublanes layout: (C, H*W))
# ----------------------------------------------------------------------------
def _make_patch(x, masks, *, W, HW, roll_forward):
    """im2col patch of a 3x3 SAME conv.  x: (Cin, HW) -> (9*Cin, HW), tap-major."""
    taps = []
    for dy in range(3):
        for dx in range(3):
            s = (dy - 1) * W + (dx - 1)          # flat source offset: out[p] = x[p + s]
            if s == 0:
                shifted = x
            else:
                amt = (-s) % HW if roll_forward else s % HW
                shifted = pltpu.roll(x, amt, axis=1)
            if not (dy == 1 and dx == 1):
                shifted = shifted * masks[3 * dy + dx]
            taps.append(shifted)
    return jnp.concatenate(taps, axis=0)


def _bilinear_warp_lanes(x, fx, fy, col, row, H, W):
    """warp_with_flow(): grid_sample(x, flow + grid, bilinear, zeros, align_corners=True).
    x: (C, HW); fx, fy: (1, HW) pixel-space flow; col/row: (1, HW) base grid coords."""
    HW = H * W
    px = fx + col
    py = fy + row
    x0 = jnp.floor(px)
    y0 = jnp.floor(py)
    x1 = x0 + 1.0
    y1 = y0 + 1.0
    wx1 = px - x0
    wx0 = 1.0 - wx1
    wy1 = py - y0
    wy0 = 1.0 - wy1
    src = lax.broadcasted_iota(jnp.int32, (HW, HW), 0)      # source flat index per row
    sel = jnp.zeros((HW, HW), jnp.float32)
    for cx, cy, wgt in ((x0, y0, wx0 * wy0), (x1, y0, wx1 * wy0),
                        (x0, y1, wx0 * wy1), (x1, y1, wx1 * wy1)):
        inb = (cx >= 0.0) & (cx <= float(W - 1)) & (cy >= 0.0) & (cy <= float(H - 1))
        wv = jnp.where(inb, wgt, 0.0)                                   # (1, HW)
        sidx = jnp.clip((cy * float(W) + cx).astype(jnp.int32), 0, HW - 1)
        sel = sel + jnp.where(src == sidx, wv, 0.0)
    # (C, HW) @ (HW, HW): K and N are full MXU width; weights kept f32 for fidelity.
    return jnp.dot(x, sel, preferred_element_type=jnp.float32)


# ----------------------------------------------------------------------------
# Pallas kernel: all n_future steps; grid = (B, n_future), state in VMEM scratch
# ----------------------------------------------------------------------------
def _res_future_kernel(sample_ref, hidden_ref, coords_ref, masks_ref,
                       w_samp_ref, w_state_ref, off_shift_ref, w_pred_ref, b_pred_ref,
                       wx0_ref, wth0_ref, wx1_ref, wth1_ref, wx2_ref, wth2_ref,
                       w_sp_ref, sp_shift_ref,
                       out_ref, state_scr, samp_scr,
                       *, H, W, C, L, roll_forward):
    HW = H * W
    cc = C + L
    t_idx = pl.program_id(1)

    tap_masks = [masks_ref[k] for k in range(9)]             # 9 x (1, HW)
    patch = functools.partial(_make_patch, masks=tap_masks, W=W, HW=HW,
                              roll_forward=roll_forward)

    def mm(a, b):
        return jnp.dot(a, b, preferred_element_type=jnp.float32)

    # (re)initialize the carried state and the time-invariant sample contributions
    @pl.when(t_idx == 0)
    def _():
        state_scr[...] = hidden_ref[0].astype(jnp.float32)
        samp_scr[...] = mm(w_samp_ref[...],
                           patch(sample_ref[0].astype(jnp.float32)))   # (cc+3C, HW)

    state = state_scr[...]                                   # (C, HW)
    S = samp_scr[...]                                        # rows: [offset | gru0-ur | gru0-t]
    col = coords_ref[0]                                      # (1, HW) x coordinate
    row = coords_ref[1]                                      # (1, HW) y coordinate

    # all contributions of the shared current_state patch in ONE stacked matmul
    T = mm(w_state_ref[...], patch(state))                   # rows: [offset | ur0 | ur1 | ur2]

    # ---- flow branch: offset_conv (BN scale folded) -> ReLU -> 1x1 offset_pred (VPU)
    feat = jnp.maximum(S[:cc] + T[:cc] + off_shift_ref[...], 0.0)
    wp = w_pred_ref[...]                                     # (cc, 2)
    bp = b_pred_ref[...]                                     # (2, 1)
    fx = jnp.sum(feat * wp[:, 0:1], axis=0, keepdims=True) + bp[0:1, :]   # (1, HW)
    fy = jnp.sum(feat * wp[:, 1:2], axis=0, keepdims=True) + bp[1:2, :]   # (1, HW)

    # ---- warp_with_flow
    warp = _bilinear_warp_lanes(state, fx, fy, col, row, H, W)            # (C, HW)

    # ---- GRU cell 0 (input = [warp, sample], hidden = current_state)
    x0 = mm(wx0_ref[...], patch(warp))                       # (3C, HW): [update|reset|cand-x]
    ur = x0[:2 * C] + S[cc:cc + 2 * C] + T[cc:cc + 2 * C]
    u = jax.nn.sigmoid(ur[:C])
    r = jax.nn.sigmoid(ur[C:])
    cand = jnp.tanh(x0[2 * C:] + S[cc + 2 * C:]
                    + mm(wth0_ref[...], patch((1.0 - r) * state)))
    ws = (1.0 - u) * state + u * cand

    # ---- GRU cells 1 & 2 (input = ws, hidden = current_state)
    for i, (wx_ref, wth_ref) in enumerate(((wx1_ref, wth1_ref), (wx2_ref, wth2_ref))):
        xi = mm(wx_ref[...], patch(ws))                      # (3C, HW)
        t_lo = cc + 2 * C + i * 2 * C
        ur = xi[:2 * C] + T[t_lo:t_lo + 2 * C]
        u = jax.nn.sigmoid(ur[:C])
        r = jax.nn.sigmoid(ur[C:])
        cand = jnp.tanh(xi[2 * C:] + mm(wth_ref[...], patch((1.0 - r) * state)))
        ws = (1.0 - u) * state + u * cand

    # ---- spatial_conv (BN scale folded) -> ReLU
    out = jnp.maximum(mm(w_sp_ref[...], patch(ws)) + sp_shift_ref[...], 0.0)

    state_scr[...] = out                                     # carry to the next future step
    out_ref[0, 0] = out.astype(out_ref.dtype)


# ----------------------------------------------------------------------------
# host-side helpers & wrapper
# ----------------------------------------------------------------------------
def _flat_w(w):
    """(3, 3, Cin, Cout) HWIO -> (Cout, 9*Cin) matching the tap-major im2col patch."""
    kh, kw, cin, cout = w.shape
    return jnp.transpose(w.reshape(kh * kw * cin, cout), (1, 0))


def _grid_constants(H, W):
    HW = H * W
    idx = jnp.arange(HW, dtype=jnp.int32)
    col = (idx % W).astype(jnp.float32)
    row = (idx // W).astype(jnp.float32)
    coords = jnp.stack([col, row], axis=0).reshape(2, 1, HW)
    masks = []
    for dy in range(3):
        for dx in range(3):
            m = jnp.ones((HW,), jnp.float32)
            if dx == 0:
                m = m * (col >= 1.0)
            if dx == 2:
                m = m * (col <= float(W - 2))
            if dy == 0:
                m = m * (row >= 1.0)
            if dy == 2:
                m = m * (row <= float(H - 2))
            masks.append(m)
    masks = jnp.stack(masks, axis=0).reshape(9, 1, HW)
    return coords, masks


def _roll_matches_jnp():
    """Tiny probe kernel: does pltpu.roll follow jnp.roll's rotation convention?"""
    def k(x_ref, o_ref):
        o_ref[...] = pltpu.roll(x_ref[...], 1, axis=1)
    x = jnp.arange(8 * 128, dtype=jnp.float32).reshape(8, 128)
    out = pl.pallas_call(k, out_shape=jax.ShapeDtypeStruct((8, 128), jnp.float32))(x)
    return bool(jnp.array_equal(out, jnp.roll(x, 1, axis=1)))


@functools.partial(jax.jit, static_argnums=(3, 4))
def res_future_prediction(sample_nchw, hidden_nchw, params, n_future, roll_forward=True):
    """Forward pass of ResFuturePrediction.
    sample_nchw: (B, L, H, W), hidden_nchw: (B, C, H, W).
    Returns (B, n_future, C, H, W) - same layout as torch.stack(res, dim=1)."""
    B, L, H, W = sample_nchw.shape
    C = hidden_nchw.shape[1]
    HW = H * W
    cc = C + L
    assert len(params["gru"]) == 3, "kernel is written for n_gru_blocks=3"

    sample = sample_nchw.reshape(B, L, HW)
    hidden = hidden_nchw.reshape(B, C, HW)
    coords, masks = _grid_constants(H, W)

    # ---- BN scale folding + per-input-part weight flattening (host, once per call) ----
    off_scale = params["off_scale"].reshape(-1, 1)
    off_shift = params["off_shift"].reshape(-1, 1)
    w_off = params["w_off"]                                 # input = [sample(L), state(C)]
    wo_s = _flat_w(w_off[:, :, :L, :]) * off_scale          # (cc, 9L)
    wo_h = _flat_w(w_off[:, :, L:, :]) * off_scale          # (cc, 9C)

    g0, g1, g2 = params["gru"]
    wur0 = jnp.concatenate([g0["wu"], g0["wr"]], axis=3)    # fuse update|reset on Cout
    wur1 = jnp.concatenate([g1["wu"], g1["wr"]], axis=3)
    wur2 = jnp.concatenate([g2["wu"], g2["wr"]], axis=3)

    # GRU0 conv input channels: [warp(C), sample(L), state(C)]
    w0ur_w = _flat_w(wur0[:, :, :C, :])
    w0ur_s = _flat_w(wur0[:, :, C:C + L, :])
    w0ur_h = _flat_w(wur0[:, :, C + L:, :])
    w0t_w = _flat_w(g0["wt"][:, :, :C, :])
    w0t_s = _flat_w(g0["wt"][:, :, C:C + L, :])
    w0t_h = _flat_w(g0["wt"][:, :, C + L:, :])
    # GRU1/2 conv input channels: [ws(C), state(C)]
    w1ur_x = _flat_w(wur1[:, :, :C, :])
    w1ur_h = _flat_w(wur1[:, :, C:, :])
    w1t_x = _flat_w(g1["wt"][:, :, :C, :])
    w1t_h = _flat_w(g1["wt"][:, :, C:, :])
    w2ur_x = _flat_w(wur2[:, :, :C, :])
    w2ur_h = _flat_w(wur2[:, :, C:, :])
    w2t_x = _flat_w(g2["wt"][:, :, :C, :])
    w2t_h = _flat_w(g2["wt"][:, :, C:, :])

    # stacked weights: all consumers of the sample patch / of the state patch / per gate-input
    w_samp = jnp.concatenate([wo_s, w0ur_s, w0t_s], axis=0)              # (cc+3C, 9L)
    w_state = jnp.concatenate([wo_h, w0ur_h, w1ur_h, w2ur_h], axis=0)    # (cc+6C, 9C)
    wx0 = jnp.concatenate([w0ur_w, w0t_w], axis=0)                       # (3C, 9C)
    wx1 = jnp.concatenate([w1ur_x, w1t_x], axis=0)                       # (3C, 9C)
    wx2 = jnp.concatenate([w2ur_x, w2t_x], axis=0)                       # (3C, 9C)

    sp_scale = params["sp_scale"].reshape(-1, 1)
    sp_shift = params["sp_shift"].reshape(-1, 1)
    w_sp = _flat_w(params["w_sp"]) * sp_scale                            # (C, 9C)

    const_args = [coords, masks, w_samp, w_state, off_shift,
                  params["w_pred"], params["b_pred"].reshape(2, 1),
                  wx0, w0t_h, wx1, w1t_h, wx2, w2t_h, w_sp, sp_shift]

    in_specs = [
        pl.BlockSpec((1, L, HW), lambda b, t: (b, 0, 0)),
        pl.BlockSpec((1, C, HW), lambda b, t: (b, 0, 0)),
    ] + [pl.BlockSpec(w.shape, lambda b, t, _nd=w.ndim: (0,) * _nd)
         for w in const_args]

    kernel = functools.partial(_res_future_kernel, H=H, W=W, C=C, L=L,
                               roll_forward=roll_forward)

    out = pl.pallas_call(
        kernel,
        out_shape=jax.ShapeDtypeStruct((B, n_future, C, HW), jnp.float32),
        grid=(B, n_future),
        in_specs=in_specs,
        out_specs=pl.BlockSpec((1, 1, C, HW), lambda b, t: (b, t, 0, 0)),
        scratch_shapes=[pltpu.VMEM((C, HW), jnp.float32),
                        pltpu.VMEM((cc + 3 * C, HW), jnp.float32)],
        compiler_params=pltpu.CompilerParams(
            dimension_semantics=("parallel", "arbitrary")),
    )(sample, hidden, *const_args)
    return out.reshape(B, n_future, C, H, W)


# ----------------------------------------------------------------------------
# deterministic parameter init (shapes follow the module's __init__; HWIO weights)
# ----------------------------------------------------------------------------
def init_params(key, in_channels, latent_dim, n_gru_blocks=3):
    C, L = in_channels, latent_dim
    cc = C + L
    keys = list(jax.random.split(key, 8 + 3 * n_gru_blocks))
    it = iter(keys)

    def conv_w(k, cin, cout, std=0.1):
        return (std * jax.random.normal(k, (3, 3, cin, cout))).astype(jnp.float32)

    def bn(k, c):
        k1, k2, k3, k4 = jax.random.split(k, 4)
        gamma = 1.0 + 0.1 * jax.random.normal(k1, (c,))
        beta = 0.1 * jax.random.normal(k2, (c,))
        mean = 0.05 * jax.random.normal(k3, (c,))
        var = 1.0 + 0.1 * jnp.abs(jax.random.normal(k4, (c,)))
        scale = gamma / jnp.sqrt(var + 1e-5)
        shift = beta - mean * scale
        return (scale.reshape(1, c).astype(jnp.float32),
                shift.reshape(1, c).astype(jnp.float32))

    params = {}
    params["w_off"] = conv_w(next(it), cc, cc)                        # offset_conv
    params["off_scale"], params["off_shift"] = bn(next(it), cc)
    params["w_pred"] = (0.02 * jax.random.normal(next(it), (cc, 2))).astype(jnp.float32)
    params["b_pred"] = jnp.zeros((1, 2), jnp.float32)                 # init_weights(): zero bias
    gru = []
    gin = C + L
    for _ in range(n_gru_blocks):
        gru.append({"wu": conv_w(next(it), gin + C, C),
                    "wr": conv_w(next(it), gin + C, C),
                    "wt": conv_w(next(it), gin + C, C)})
        gin = C
    params["gru"] = gru
    params["w_sp"] = conv_w(next(it), C, C)                           # spatial_conv
    params["sp_scale"], params["sp_shift"] = bn(next(it), C)
    return params


# ----------------------------------------------------------------------------
# pure-JAX reference (NHWC, for correctness check only; uses the un-folded params)
# ----------------------------------------------------------------------------
def _conv3x3_ref(x, w):
    return lax.conv_general_dilated(x, w, (1, 1), "SAME",
                                    dimension_numbers=("NHWC", "HWIO", "NHWC"),
                                    precision=lax.Precision.HIGHEST)


def _warp_ref(x, flow):
    B, H, W, C = x.shape
    col = jnp.arange(W, dtype=jnp.float32)[None, None, :]
    row = jnp.arange(H, dtype=jnp.float32)[None, :, None]
    px = flow[..., 0] + col
    py = flow[..., 1] + row
    x0, y0 = jnp.floor(px), jnp.floor(py)
    x1, y1 = x0 + 1.0, y0 + 1.0
    wx1, wy1 = px - x0, py - y0
    wx0, wy0 = 1.0 - wx1, 1.0 - wy1
    bidx = jnp.arange(B)[:, None, None]

    def tap(cy, cx, wgt):
        inb = (cx >= 0) & (cx <= W - 1) & (cy >= 0) & (cy <= H - 1)
        xi = jnp.clip(cx, 0, W - 1).astype(jnp.int32)
        yi = jnp.clip(cy, 0, H - 1).astype(jnp.int32)
        return x[bidx, yi, xi] * (wgt * inb)[..., None]

    return (tap(y0, x0, wy0 * wx0) + tap(y0, x1, wy0 * wx1)
            + tap(y1, x0, wy1 * wx0) + tap(y1, x1, wy1 * wx1))


def _step_ref(sample, state, p):
    combine = jnp.concatenate([sample, state], axis=-1)
    t = _conv3x3_ref(combine, p["w_off"])
    t = t * p["off_scale"].reshape(1, 1, 1, -1) + p["off_shift"].reshape(1, 1, 1, -1)
    t = jnp.maximum(t, 0.0)
    flow = jnp.einsum("bhwc,cf->bhwf", t, p["w_pred"],
                      precision=lax.Precision.HIGHEST) + p["b_pred"].reshape(1, 1, 1, 2)
    ws = jnp.concatenate([_warp_ref(state, flow), sample], axis=-1)
    for g in p["gru"]:
        xs = jnp.concatenate([ws, state], axis=-1)
        u = jax.nn.sigmoid(_conv3x3_ref(xs, g["wu"]))
        r = jax.nn.sigmoid(_conv3x3_ref(xs, g["wr"]))
        c = jnp.concatenate([ws, (1.0 - r) * state], axis=-1)
        st = jnp.tanh(_conv3x3_ref(c, g["wt"]))
        ws = (1.0 - u) * state + u * st
    out = _conv3x3_ref(ws, p["w_sp"])
    out = out * p["sp_scale"].reshape(1, 1, 1, -1) + p["sp_shift"].reshape(1, 1, 1, -1)
    return jnp.maximum(out, 0.0)


# ----------------------------------------------------------------------------
if __name__ == "__main__":
    B, C, L, H, W = 2, 8, 8, 16, 16
    n_future = 2

    key = jax.random.PRNGKey(0)
    k1, k2, k3 = jax.random.split(key, 3)
    # NCHW inputs exactly like the PyTorch module: sample (B, L, H, W), hidden (B, C, H, W)
    sample_nchw = jax.random.normal(k1, (B, L, H, W), jnp.float32)
    hidden_nchw = jax.random.normal(k2, (B, C, H, W), jnp.float32)
    params = init_params(k3, in_channels=C, latent_dim=L, n_gru_blocks=3)

    roll_fwd = _roll_matches_jnp()

    out = res_future_prediction(sample_nchw, hidden_nchw, params, n_future, roll_fwd)
    out = jax.block_until_ready(out)
    assert out.shape == (B, n_future, C, H, W)

    # pure-JAX NHWC reference check
    sample_nhwc = jnp.transpose(sample_nchw, (0, 2, 3, 1))
    state = jnp.transpose(hidden_nchw, (0, 2, 3, 1))
    ref = []
    for _ in range(n_future):
        state = _step_ref(sample_nhwc, state, params)
        ref.append(state)
    ref = jnp.transpose(jnp.stack(ref, axis=1), (0, 1, 4, 2, 3))
    err = float(jnp.max(jnp.abs(out - ref)))
    assert err < 2e-3, f"max abs err too large: {err}"

    print("KERNEL_OK")
</pallas_src>

<mosaic_0001>
module attributes {stable_mosaic.version = 11 : i64} {
  func.func @k(%arg0: memref<8x128xf32, #tpu.memory_space<vmem>>, %arg1: memref<8x128xf32, #tpu.memory_space<vmem>>) attributes {dimension_semantics = [], scalar_prefetch = 0 : i64, scratch_operands = 0 : i64, tpu.core_type = #tpu.core_type<tc>} {
    %c0 = arith.constant 0 : index
    %c0_0 = arith.constant 0 : index
    %0 = vector.load %arg0[%c0, %c0_0] : memref<8x128xf32, #tpu.memory_space<vmem>>, vector<8x128xf32>
    %c1_i32 = arith.constant 1 : i32
    %1 = tpu.dynamic_rotate %0 by %c1_i32 dim 1 : vector<8x128xf32>, i32 -> vector<8x128xf32>
    %c0_1 = arith.constant 0 : index
    %c0_2 = arith.constant 0 : index
    %2 = vector.load %arg1[%c0_1, %c0_2] : memref<8x128xf32, #tpu.memory_space<vmem>>, vector<8x128xf32>
    tpu.vector_store %arg1[%c0_1, %c0_2], %1 {strides = array<i32>} : memref<8x128xf32, #tpu.memory_space<vmem>>, vector<8x128xf32>,
    return
  }
}

</mosaic_0001>

<bundles_post_ra>
// kernel: tpu_custom_call.1
= control target key start
LH: loop header
LB: loop body
LE: loop exit
PB: predicated region body
PF: predicated region fallthrough
CT: control target
= control target key end

     0   :  { %6 = vsyncpa [#allocation3], 0  ;;  %s128_s0 = inlined_call_operand.hbm [shape: f32[8,128], index: 0, kind: input, shape index: {}]   ;;  %s129_s1 = inlined_call_operand.hbm [shape: f32[8,128], index: 1, kind: output, shape index: {}]  }
   0x1   :  { %7 = vsyncpa [#allocation4], 0  ;;  %s91_s6 = smov [#allocation2]   ;;  %s43_s10 = scalar_lea.hbm %s128_s0, 128 }
   0x2   :  { %s14_s7 = sshll.u32 %s91_s6, 4  ;;  %p44_p0 = scmp.ne.s32.totalorder %s128_s0, %s43_s10  ;;  %s15_s7 = int_to_ptr.vmem [resolvable:$true] %s14_s7 }
   0x3   :  { %p47_p1 = scmp.lt.u32.totalorder %s43_s10, %s128_s0 }
   0x5   :  { %p49_p2 = pnand %p47_p1, %p44_p0 }
   0x7   :  { %52 = shalt.err (!%p49_p2)
}
   0x8   :  { %s53_s15 = scalar_lea.vmem %s15_s7, 128  ;;  %p58_p4 = scmp.lt.s32.totalorder %s15_s7, %s15_s7 }
   0x9   :  { %p54_p3 = scmp.ne.s32.totalorder %s15_s7, %s53_s15  ;;  %p59_p5 = scmp.lt.s32.totalorder %s53_s15, %s53_s15 }
   0xb   :  { %p60_p6 = por %p59_p5, %p58_p4 }
   0xd   :  { %p61_p7 = pnand %p60_p6, %p54_p3 }
   0xf   :  { %64 = shalt.err (!%p61_p7)
}
  0x10   :  { %17 = dma.hbm_to_vmem [thread:$0]  %s128_s0, 128, %s15_s7, [#allocation3]  }
  0x11   :  { %87 = dma.done.wait [#allocation3], 128  }
  0x12   :  { %88 = vsyncadd [#allocation3], 4294967168  ;;  %v21_v0 = vld [vmem:[#allocation2] sm:$0xff]  ;;  %s92_s18 = smov 1   ;;  %s93_s19 = smov [#allocation5]  }
  0x13   :  { %22 = vrot.lane.b32.xlu0 %v21_v0, %s92_s18  ;;  %s31_s20 = sshll.u32 %s93_s19, 4  ;;  %s32_s20 = int_to_ptr.vmem [resolvable:$true] %s31_s20 }
  0x14   :  { %s65_s21 = scalar_lea.vmem %s32_s20, 128  ;;  %p70_p9 = scmp.lt.s32.totalorder %s32_s20, %s32_s20 }
  0x15   :  { %p66_p8 = scmp.ne.s32.totalorder %s32_s20, %s65_s21  ;;  %p71_p10 = scmp.lt.s32.totalorder %s65_s21, %s65_s21 }
  0x17   :  { %p72_p11 = por %p71_p10, %p70_p9 }
  0x19   :  { %p73_p12 = pnand %p72_p11, %p66_p8 }
  0x85   :  { %v23_v1 = vpop.permute.xlu0 %22 }
  0x86   :  { %24 = vst [vmem:[#allocation5] sm:$0xff] %v23_v1 }
  0x87   :  { %76 = shalt.err (!%p73_p12)
}
  0x88   :  { %s77_s0 = scalar_lea.hbm %s129_s1, 128 }
  0x89   :  { %p78_p13 = scmp.ne.s32.totalorder %s129_s1, %s77_s0  ;;  %p81_p0 = scmp.lt.u32.totalorder %s77_s0, %s129_s1 }
  0x8b   :  { %p83_p1 = pnand %p81_p0, %p78_p13 }
  0x8d   :  { %86 = shalt.err (!%p83_p1)
}
  0x8e   :  { %34 = dma.vmem_to_hbm [thread:$0]  %s32_s20, 128, %s129_s1, [#allocation4]  }
  0x8f   :  { %89 = dma.done.wait [#allocation4], 128  }
  0x90   :  { %90 = vsyncadd [#allocation4], 4294967168 }
  0x91   :  { %38 = vsyncpa [#allocation3], 1 }
  0x92   :  { %39 = vsyncpa [#allocation4], 1 }

</bundles_post_ra>
